<compile_context>
chip_gen: v7x
topology: tpu7x:2x2x1
jax: 0.10.0
libtpu: 0.0.40
codegen_flags: <defaults>
</compile_context>

<pallas_src>
import functools

import jax
import jax.numpy as jnp
import numpy as np
from jax.experimental import pallas as pl
from jax.experimental.pallas import tpu as pltpu

BN_EPS = 1e-5
SUBLANE = 8


def _round_up(x, m):
    return (x + m - 1) // m * m


def _lane_pad(c):
    # v6e/v7x MXUs are 256-wide: feed them full width for large Cout; 128 is
    # already full width on v5e and wastes less padding for small Cout.
    return _round_up(c, 256) if c >= 256 else _round_up(c, 128)


def _vmem_capacity_bytes():
    try:
        return int(pltpu.get_tpu_info().vmem_capacity_bytes)
    except Exception:
        return 64 * 1024 * 1024          # conservative (v7x) fallback


def _vmem_limit_bytes(r_in, cin4, tile_rows, cout_p):
    phase1 = (2 * r_in * cin4 * 4            # parity planes (f32, 2 buffers)
              + 2 * 4 * cin4 * cout_p * 2    # stacked bf16 weights
              + 2 * tile_rows * 4            # validity mask
              + 2 * tile_rows * cout_p * 2   # bf16 y' output blocks
              + 2 * 8 * cout_p * 4           # per-tile stats blocks
              + tile_rows * cout_p * 4)      # f32 accumulator scratch
    phase2 = 2 * tile_rows * cout_p * (2 + 4) + 4 * cout_p * 4
    need = max(phase1, phase2) * 3 // 2 + (4 << 20)
    cap = _vmem_capacity_bytes()
    return int(min(max(need, 32 << 20), int(cap * 0.9)))


# ---------------------------------------------------------------------------
# Phase 1: fused im2col conv (9 taps via 4 shift-matmuls) + per-tile BN
#          partial statistics.  Fully parallel grid (no carried accumulator).
# ---------------------------------------------------------------------------
def _conv_stats_kernel(p_ref, w_ref, mask_ref, y_ref, stats_ref, acc_ref,
                       *, tile_rows, owp):
    """One (image, row-tile) grid step.

    p_ref    : (r_in, 4*Cin) f32   parity planes of one image, lane-packed in
                                   order [(a,b) for a in (0,1) for b in (0,1)];
                                   resident across the inner grid axis.
    w_ref    : (4, 4*Cin, cout_p) bf16  per-shift stacked conv weights.
    mask_ref : (tile_rows, 1) f32  1.0 on rows that are real conv outputs.
    y_ref    : (tile_rows, cout_p) bf16  pre-BN activations (out).
    stats_ref: (8, cout_p) f32     rows 0/1 = per-tile sum / sum-of-squares.
    acc_ref  : (tile_rows, cout_p) f32  VMEM accumulator scratch.
    """
    ob = pl.program_id(1)
    row0 = pl.multiple_of(ob * tile_rows, SUBLANE)

    # One MXU matmul per output shift (dh, dw) in {0,1}^2; together they cover
    # all 9 conv taps (bias omitted: BatchNorm cancels it exactly).
    shifts = (0, 1, owp, owp + 1)
    slab = p_ref[pl.ds(row0 + shifts[0], tile_rows), :].astype(jnp.bfloat16)
    acc_ref[...] = jnp.dot(slab, w_ref[0], preferred_element_type=jnp.float32)
    for si in (1, 2, 3):
        slab = p_ref[pl.ds(row0 + shifts[si], tile_rows), :].astype(jnp.bfloat16)
        acc_ref[...] += jnp.dot(slab, w_ref[si],
                                preferred_element_type=jnp.float32)

    yq = acc_ref[...].astype(jnp.bfloat16)   # bf16 intermediate: HBM traffic /2
    y_ref[...] = yq

    # Per-tile partial batch statistics over *valid* rows only (the fused
    # plane layout yields one junk row per OWp boundary which must not
    # pollute the stats).  No concat, no carried accumulator.
    yf = yq.astype(jnp.float32)
    yv = yf * mask_ref[...]
    stats_ref[...] = jnp.zeros_like(stats_ref)
    stats_ref[0:1, :] = jnp.sum(yv, axis=0, keepdims=True)
    stats_ref[1:2, :] = jnp.sum(yv * yf, axis=0, keepdims=True)


# ---------------------------------------------------------------------------
# Phase 2: BatchNorm normalize + affine + ReLU (elementwise, fully parallel).
# ---------------------------------------------------------------------------
def _bn_relu_kernel(y_ref, stats_ref, g_ref, beta_ref, o_ref, *, m_valid):
    inv_m = 1.0 / float(m_valid)
    mean = stats_ref[0:1, :] * inv_m
    var = jnp.maximum(stats_ref[1:2, :] * inv_m - mean * mean, 0.0)
    scale = g_ref[...] * jax.lax.rsqrt(var + BN_EPS)
    shift = beta_ref[...] - mean * scale
    # TODO(synk): dropout path (dp=True) not implemented; module default dp=False.
    o_ref[...] = jnp.maximum(y_ref[...].astype(jnp.float32) * scale + shift, 0.0)


def encoder_block_forward_nhwc(x_nhwc, weight, bias, gamma, beta):
    """Fused Conv(3x3, s2, p1) + BatchNorm(batch stats) + ReLU.

    x_nhwc: (N, H, W, Cin) f32 -> (N, OH, OW, Cout) f32.
    `bias` is accepted for parity with nn.Conv2d but is mathematically
    cancelled by BatchNorm (shift invariance), so it is not used.
    """
    del bias
    N, H, W, Cin = x_nhwc.shape
    Cout = weight.shape[0]
    OH = (H + 2 - 3) // 2 + 1
    OW = (W + 2 - 3) // 2 + 1
    OHp, OWp = OH + 1, OW + 1
    cout_p = _lane_pad(Cout)
    cin4 = 4 * Cin

    # ---- adaptive row-tile sizing (v7x has half the VMEM of v5e/v6e) -------
    rows_needed = OH * OWp                       # plane-grid rows covering all valid outputs
    max_tile = min(1024, max(SUBLANE,
                             ((2 << 20) // (cout_p * 4)) // SUBLANE * SUBLANE))
    tile_rows = min(max_tile, _round_up(rows_needed, SUBLANE))
    r_out = _round_up(rows_needed, tile_rows)
    n_ob = r_out // tile_rows
    # + max tap shift (OWp + 1) of slack so in-kernel shifted slices stay in bounds.
    # TODO(synk): for very large per-image planes (>> VMEM) switch the plane
    # residency to manual halo DMAs instead of a whole-image BlockSpec block.
    r_in = _round_up(r_out + OWp + 1, SUBLANE)

    # ---- glue: space-to-depth parity planes (≈1x the input bytes) ----------
    # P[a,b][n,i,j,:] = padded_x[n, 2i+a, 2j+b, :]
    xp = jnp.pad(x_nhwc, ((0, 0), (1, 1), (1, 1), (0, 0)))
    planes = []
    for a in (0, 1):
        for b in (0, 1):
            p = xp[:, a::2, b::2, :][:, :OHp, :OWp, :]
            p = jnp.pad(p, ((0, 0), (0, OHp - p.shape[1]),
                            (0, OWp - p.shape[2]), (0, 0)))
            planes.append(p)
    packed = jnp.concatenate(planes, axis=-1)            # (N, OHp, OWp, 4*Cin)
    packed = packed.reshape(N, OHp * OWp, cin4)
    packed = jnp.pad(packed, ((0, 0), (0, r_in - OHp * OWp), (0, 0)))
    packed = packed.reshape(N * r_in, cin4).astype(jnp.float32)

    # ---- per-shift stacked weights: (4, 4*Cin, cout_p), bf16 ----------------
    w_hwio = jnp.transpose(weight, (2, 3, 1, 0)).astype(jnp.float32)  # (3,3,Cin,Cout)
    shift_blocks = []
    for dh in (0, 1):
        for dw in (0, 1):
            rows = []
            for a in (0, 1):
                for b in (0, 1):
                    kh, kw = a + 2 * dh, b + 2 * dw
                    if kh <= 2 and kw <= 2:
                        rows.append(w_hwio[kh, kw])
                    else:
                        rows.append(jnp.zeros((Cin, Cout), jnp.float32))
            shift_blocks.append(jnp.concatenate(rows, axis=0))
    w_stack = jnp.stack(shift_blocks, axis=0)              # (4, 4*Cin, Cout)
    w_stack = jnp.pad(w_stack, ((0, 0), (0, 0), (0, cout_p - Cout)))
    w_stack = w_stack.astype(jnp.bfloat16)

    # Validity mask over plane-grid rows (junk rows: OWp-th column + tail pad).
    r = jnp.arange(r_out)
    mask = ((r < OH * OWp) & (r % OWp < OW)).astype(jnp.float32).reshape(r_out, 1)

    g2d = jnp.pad(gamma.astype(jnp.float32).reshape(1, Cout),
                  ((0, 0), (0, cout_p - Cout)))
    be2d = jnp.pad(beta.astype(jnp.float32).reshape(1, Cout),
                   ((0, 0), (0, cout_p - Cout)))

    vmem_limit = _vmem_limit_bytes(r_in, cin4, tile_rows, cout_p)

    # ---- phase 1: fused conv + per-tile partial stats (fully parallel) ------
    y_pre, stats_parts = pl.pallas_call(
        functools.partial(_conv_stats_kernel, tile_rows=tile_rows, owp=OWp),
        out_shape=(jax.ShapeDtypeStruct((N * r_out, cout_p), jnp.bfloat16),
                   jax.ShapeDtypeStruct((N * n_ob * 8, cout_p), jnp.float32)),
        grid_spec=pltpu.PrefetchScalarGridSpec(
            num_scalar_prefetch=0,
            grid=(N, n_ob),
            in_specs=[pl.BlockSpec((r_in, cin4), lambda n, ob: (n, 0)),
                      pl.BlockSpec((4, cin4, cout_p), lambda n, ob: (0, 0, 0)),
                      pl.BlockSpec((tile_rows, 1), lambda n, ob: (ob, 0))],
            out_specs=(pl.BlockSpec((tile_rows, cout_p),
                                    lambda n, ob: (n * n_ob + ob, 0)),
                       pl.BlockSpec((8, cout_p),
                                    lambda n, ob: (n * n_ob + ob, 0))),
            scratch_shapes=[pltpu.VMEM((tile_rows, cout_p), jnp.float32)]),
        compiler_params=pltpu.CompilerParams(
            dimension_semantics=("parallel", "parallel"),   # megacore on v7x
            vmem_limit_bytes=vmem_limit),
    )(packed, w_stack, mask)

    # Tree-sum the per-tile partials in XLA (tiny; better numerics than a
    # single serial accumulation).
    stats = stats_parts.reshape(N * n_ob, 8, cout_p)[:, :2, :].sum(axis=0)

    # ---- phase 2: normalize + gamma/beta + ReLU ------------------------------
    y_bn = pl.pallas_call(
        functools.partial(_bn_relu_kernel, m_valid=N * OH * OW),
        out_shape=jax.ShapeDtypeStruct((N * r_out, cout_p), jnp.float32),
        grid_spec=pltpu.PrefetchScalarGridSpec(
            num_scalar_prefetch=0,
            grid=(N * n_ob,),
            in_specs=[pl.BlockSpec((tile_rows, cout_p), lambda i: (i, 0)),
                      pl.BlockSpec((2, cout_p), lambda i: (0, 0)),
                      pl.BlockSpec((1, cout_p), lambda i: (0, 0)),
                      pl.BlockSpec((1, cout_p), lambda i: (0, 0))],
            out_specs=pl.BlockSpec((tile_rows, cout_p), lambda i: (i, 0))),
        compiler_params=pltpu.CompilerParams(
            dimension_semantics=("parallel",),
            vmem_limit_bytes=vmem_limit),
    )(y_pre, stats, g2d, be2d)

    # ---- extract the valid (N, OH, OW, Cout) slab from the plane grid ------
    y_bn = y_bn.reshape(N, r_out, cout_p)[:, :OH * OWp, :Cout]
    y_bn = y_bn.reshape(N, OH, OWp, Cout)[:, :, :OW, :]
    return y_bn


@jax.jit
def encoder_block_forward(x_nchw, weight, bias, gamma, beta):
    """PyTorch-layout wrapper: (N, Cin, H, W) f32 -> (N, Cout, OH, OW) f32.

    Chained encoder blocks should call encoder_block_forward_nhwc directly to
    avoid the NCHW<->NHWC transposes (each is a full HBM round trip in XLA).
    """
    x_nhwc = jnp.transpose(x_nchw, (0, 2, 3, 1))
    y = encoder_block_forward_nhwc(x_nhwc, weight, bias, gamma, beta)
    return jnp.transpose(y, (0, 3, 1, 2))


def _reference(x_nchw, weight, bias, gamma, beta):
    """Pure-JAX reference with the kernel's bf16-operand policy.

    Keeps the conv bias (the kernel drops it; BatchNorm cancels it exactly)
    and keeps the pre-BN activations in f32 (the kernel stores them in bf16),
    so the comparison bounds both approximations at once.
    """
    xq = x_nchw.astype(jnp.bfloat16).astype(jnp.float32)
    wq = weight.astype(jnp.bfloat16).astype(jnp.float32)
    y = jax.lax.conv_general_dilated(
        xq, wq, window_strides=(2, 2), padding=((1, 1), (1, 1)),
        dimension_numbers=("NCHW", "OIHW", "NCHW"))
    y = y + bias.reshape(1, -1, 1, 1)
    mean = jnp.mean(y, axis=(0, 2, 3), keepdims=True)
    var = jnp.mean((y - mean) ** 2, axis=(0, 2, 3), keepdims=True)
    y = (y - mean) / jnp.sqrt(var + BN_EPS)
    y = y * gamma.reshape(1, -1, 1, 1) + beta.reshape(1, -1, 1, 1)
    return jnp.maximum(y, 0.0)


if __name__ == "__main__":
    N, Cin, H, W = 2, 4, 16, 16
    Cout = 8

    key = jax.random.PRNGKey(0)
    kx, kwt, kb = jax.random.split(key, 3)

    x = jax.random.normal(kx, (N, Cin, H, W), dtype=jnp.float32)

    # Deterministic parameter init (Conv2d: uniform(-1/sqrt(fan_in), ...)).
    fan_in = Cin * 3 * 3
    bound = 1.0 / np.sqrt(fan_in)
    weight = jax.random.uniform(kwt, (Cout, Cin, 3, 3), jnp.float32, -bound, bound)
    bias = jax.random.uniform(kb, (Cout,), jnp.float32, -bound, bound)
    gamma = jnp.ones((Cout,), jnp.float32)   # BatchNorm2d affine init
    beta = jnp.zeros((Cout,), jnp.float32)

    out = encoder_block_forward(x, weight, bias, gamma, beta)
    out = jax.block_until_ready(out)

    ref = np.asarray(_reference(x, weight, bias, gamma, beta))
    got = np.asarray(out)

    # Tolerance reflects the bf16 pre-BN intermediate (~1 bf16 ulp of y in
    # normalized units, i.e. ~1e-2 worst case); structural errors are O(1).
    np.testing.assert_allclose(got, ref, atol=5e-2, rtol=5e-2)
    assert float(np.mean(np.abs(got - ref))) < 1e-2

    print("KERNEL_OK")
</pallas_src>

<mosaic_0001>
module attributes {stable_mosaic.version = 11 : i64} {
  func.func @_conv_stats_kernel(%arg0: i32, %arg1: i32, %arg2: memref<88x16xf32, #tpu.memory_space<vmem>>, %arg3: memref<4x16x128xbf16, #tpu.memory_space<vmem>>, %arg4: memref<72x1xf32, #tpu.memory_space<vmem>>, %arg5: memref<72x128xbf16, #tpu.memory_space<vmem>>, %arg6: memref<8x128xf32, #tpu.memory_space<vmem>>, %arg7: memref<72x128xf32, #tpu.memory_space<vmem>>) attributes {dimension_semantics = [#tpu.dimension_semantics<parallel>, #tpu.dimension_semantics<parallel>], iteration_bounds = array<i64: 2, 1>, scalar_prefetch = 0 : i64, scratch_operands = 1 : i64, tpu.core_type = #tpu.core_type<tc>, window_params = [{transform_indices = @transform_0, window_bounds = array<i64: 88, 16>}, {pipeline_mode = #tpu.pipeline_mode<synchronous>, transform_indices = @transform_1, window_bounds = array<i64: 4, 16, 128>}, {transform_indices = @transform_2, window_bounds = array<i64: 72, 1>}, {transform_indices = @transform_3, window_bounds = array<i64: 72, 128>}, {transform_indices = @transform_4, window_bounds = array<i64: 8, 128>}]} {
    %c72_i32 = arith.constant 72 : i32
    %0 = arith.muli %arg1, %c72_i32 : i32
    %1 = tpu.assume_multiple %0, 8 : i32
    %c0_i32 = arith.constant 0 : i32
    %2 = arith.addi %1, %c0_i32 : i32
    %3 = arith.index_cast %2 : i32 to index
    %c0 = arith.constant 0 : index
    %4 = vector.load %arg2[%3, %c0] : memref<88x16xf32, #tpu.memory_space<vmem>>, vector<72x16xf32>
    %5 = arith.truncf %4 : vector<72x16xf32> to vector<72x16xbf16>
    %c0_0 = arith.constant 0 : index
    %c0_1 = arith.constant 0 : index
    %c0_2 = arith.constant 0 : index
    %6 = vector.load %arg3[%c0_0, %c0_1, %c0_2] : memref<4x16x128xbf16, #tpu.memory_space<vmem>>, vector<1x16x128xbf16>
    %7 = vector.shape_cast %6 : vector<1x16x128xbf16> to vector<16x128xbf16>
    %cst = arith.constant dense<0.000000e+00> : vector<72x128xf32>
    %8 = tpu.matmul %5, %7, %cst {dimension_numbers = #tpu.dot_dimension_numbers<[1], [0], [0], [1], [0, 0, 1, 1], [], []>} : vector<72x16xbf16>, vector<16x128xbf16>, vector<72x128xf32> -> vector<72x128xf32>
    %c0_3 = arith.constant 0 : index
    %c0_4 = arith.constant 0 : index
    %9 = vector.load %arg7[%c0_3, %c0_4] : memref<72x128xf32, #tpu.memory_space<vmem>>, vector<72x128xf32>
    tpu.vector_store %arg7[%c0_3, %c0_4], %8 {strides = array<i32>} : memref<72x128xf32, #tpu.memory_space<vmem>>, vector<72x128xf32>,
    %c1_i32 = arith.constant 1 : i32
    %10 = arith.addi %1, %c1_i32 : i32
    %11 = arith.index_cast %10 : i32 to index
    %c0_5 = arith.constant 0 : index
    %12 = vector.load %arg2[%11, %c0_5] : memref<88x16xf32, #tpu.memory_space<vmem>>, vector<72x16xf32>
    %13 = arith.truncf %12 : vector<72x16xf32> to vector<72x16xbf16>
    %c0_6 = arith.constant 0 : index
    %c0_7 = arith.constant 0 : index
    %14 = vector.load %arg7[%c0_6, %c0_7] : memref<72x128xf32, #tpu.memory_space<vmem>>, vector<72x128xf32>
    %c1 = arith.constant 1 : index
    %c0_8 = arith.constant 0 : index
    %c0_9 = arith.constant 0 : index
    %15 = vector.load %arg3[%c1, %c0_8, %c0_9] : memref<4x16x128xbf16, #tpu.memory_space<vmem>>, vector<1x16x128xbf16>
    %16 = vector.shape_cast %15 : vector<1x16x128xbf16> to vector<16x128xbf16>
    %cst_10 = arith.constant dense<0.000000e+00> : vector<72x128xf32>
    %17 = tpu.matmul %13, %16, %cst_10 {dimension_numbers = #tpu.dot_dimension_numbers<[1], [0], [0], [1], [0, 0, 1, 1], [], []>} : vector<72x16xbf16>, vector<16x128xbf16>, vector<72x128xf32> -> vector<72x128xf32>
    %18 = arith.addf %14, %17 : vector<72x128xf32>
    %c0_11 = arith.constant 0 : index
    %c0_12 = arith.constant 0 : index
    %19 = vector.load %arg7[%c0_11, %c0_12] : memref<72x128xf32, #tpu.memory_space<vmem>>, vector<72x128xf32>
    tpu.vector_store %arg7[%c0_11, %c0_12], %18 {strides = array<i32>} : memref<72x128xf32, #tpu.memory_space<vmem>>, vector<72x128xf32>,
    %c9_i32 = arith.constant 9 : i32
    %20 = arith.addi %1, %c9_i32 : i32
    %21 = arith.index_cast %20 : i32 to index
    %c0_13 = arith.constant 0 : index
    %22 = vector.load %arg2[%21, %c0_13] : memref<88x16xf32, #tpu.memory_space<vmem>>, vector<72x16xf32>
    %23 = arith.truncf %22 : vector<72x16xf32> to vector<72x16xbf16>
    %c0_14 = arith.constant 0 : index
    %c0_15 = arith.constant 0 : index
    %24 = vector.load %arg7[%c0_14, %c0_15] : memref<72x128xf32, #tpu.memory_space<vmem>>, vector<72x128xf32>
    %c2 = arith.constant 2 : index
    %c0_16 = arith.constant 0 : index
    %c0_17 = arith.constant 0 : index
    %25 = vector.load %arg3[%c2, %c0_16, %c0_17] : memref<4x16x128xbf16, #tpu.memory_space<vmem>>, vector<1x16x128xbf16>
    %26 = vector.shape_cast %25 : vector<1x16x128xbf16> to vector<16x128xbf16>
    %cst_18 = arith.constant dense<0.000000e+00> : vector<72x128xf32>
    %27 = tpu.matmul %23, %26, %cst_18 {dimension_numbers = #tpu.dot_dimension_numbers<[1], [0], [0], [1], [0, 0, 1, 1], [], []>} : vector<72x16xbf16>, vector<16x128xbf16>, vector<72x128xf32> -> vector<72x128xf32>
    %28 = arith.addf %24, %27 : vector<72x128xf32>
    %c0_19 = arith.constant 0 : index
    %c0_20 = arith.constant 0 : index
    %29 = vector.load %arg7[%c0_19, %c0_20] : memref<72x128xf32, #tpu.memory_space<vmem>>, vector<72x128xf32>
    tpu.vector_store %arg7[%c0_19, %c0_20], %28 {strides = array<i32>} : memref<72x128xf32, #tpu.memory_space<vmem>>, vector<72x128xf32>,
    %c10_i32 = arith.constant 10 : i32
    %30 = arith.addi %1, %c10_i32 : i32
    %31 = arith.index_cast %30 : i32 to index
    %c0_21 = arith.constant 0 : index
    %32 = vector.load %arg2[%31, %c0_21] : memref<88x16xf32, #tpu.memory_space<vmem>>, vector<72x16xf32>
    %33 = arith.truncf %32 : vector<72x16xf32> to vector<72x16xbf16>
    %c0_22 = arith.constant 0 : index
    %c0_23 = arith.constant 0 : index
    %34 = vector.load %arg7[%c0_22, %c0_23] : memref<72x128xf32, #tpu.memory_space<vmem>>, vector<72x128xf32>
    %c3 = arith.constant 3 : index
    %c0_24 = arith.constant 0 : index
    %c0_25 = arith.constant 0 : index
    %35 = vector.load %arg3[%c3, %c0_24, %c0_25] : memref<4x16x128xbf16, #tpu.memory_space<vmem>>, vector<1x16x128xbf16>
    %36 = vector.shape_cast %35 : vector<1x16x128xbf16> to vector<16x128xbf16>
    %cst_26 = arith.constant dense<0.000000e+00> : vector<72x128xf32>
    %37 = tpu.matmul %33, %36, %cst_26 {dimension_numbers = #tpu.dot_dimension_numbers<[1], [0], [0], [1], [0, 0, 1, 1], [], []>} : vector<72x16xbf16>, vector<16x128xbf16>, vector<72x128xf32> -> vector<72x128xf32>
    %38 = arith.addf %34, %37 : vector<72x128xf32>
    %c0_27 = arith.constant 0 : index
    %c0_28 = arith.constant 0 : index
    %39 = vector.load %arg7[%c0_27, %c0_28] : memref<72x128xf32, #tpu.memory_space<vmem>>, vector<72x128xf32>
    tpu.vector_store %arg7[%c0_27, %c0_28], %38 {strides = array<i32>} : memref<72x128xf32, #tpu.memory_space<vmem>>, vector<72x128xf32>,
    %c0_29 = arith.constant 0 : index
    %c0_30 = arith.constant 0 : index
    %40 = vector.load %arg7[%c0_29, %c0_30] : memref<72x128xf32, #tpu.memory_space<vmem>>, vector<72x128xf32>
    %41 = arith.truncf %40 : vector<72x128xf32> to vector<72x128xbf16>
    %c0_31 = arith.constant 0 : index
    %c0_32 = arith.constant 0 : index
    %42 = vector.load %arg5[%c0_31, %c0_32] : memref<72x128xbf16, #tpu.memory_space<vmem>>, vector<72x128xbf16>
    tpu.vector_store %arg5[%c0_31, %c0_32], %41 {strides = array<i32>} : memref<72x128xbf16, #tpu.memory_space<vmem>>, vector<72x128xbf16>,
    %43 = arith.extf %41 : vector<72x128xbf16> to vector<72x128xf32>
    %c0_33 = arith.constant 0 : index
    %c0_34 = arith.constant 0 : index
    %44 = vector.load %arg4[%c0_33, %c0_34] : memref<72x1xf32, #tpu.memory_space<vmem>>, vector<72x1xf32>
    %45 = vector.broadcast %44 : vector<72x1xf32> to vector<72x128xf32>
    %46 = arith.mulf %43, %45 : vector<72x128xf32>
    %cst_35 = arith.constant 0.000000e+00 : f32
    %47 = vector.broadcast %cst_35 : f32 to vector<8x128xf32>
    %c0_36 = arith.constant 0 : index
    %c0_37 = arith.constant 0 : index
    %48 = vector.load %arg6[%c0_36, %c0_37] : memref<8x128xf32, #tpu.memory_space<vmem>>, vector<8x128xf32>
    tpu.vector_store %arg6[%c0_36, %c0_37], %47 {strides = array<i32>} : memref<8x128xf32, #tpu.memory_space<vmem>>, vector<8x128xf32>,
    %cst_38 = arith.constant dense<0.000000e+00> : vector<128xf32>
    %49 = vector.multi_reduction <add>, %46, %cst_38 [0] : vector<72x128xf32> to vector<128xf32>
    %50 = vector.shape_cast %49 : vector<128xf32> to vector<1x128xf32>
    %c0_39 = arith.constant 0 : index
    %c0_40 = arith.constant 0 : index
    %51 = vector.load %arg6[%c0_39, %c0_40] : memref<8x128xf32, #tpu.memory_space<vmem>>, vector<1x128xf32>
    tpu.vector_store %arg6[%c0_39, %c0_40], %50 {strides = array<i32>} : memref<8x128xf32, #tpu.memory_space<vmem>>, vector<1x128xf32>,
    %52 = arith.mulf %46, %43 : vector<72x128xf32>
    %cst_41 = arith.constant dense<0.000000e+00> : vector<128xf32>
    %53 = vector.multi_reduction <add>, %52, %cst_41 [0] : vector<72x128xf32> to vector<128xf32>
    %54 = vector.shape_cast %53 : vector<128xf32> to vector<1x128xf32>
    %c1_42 = arith.constant 1 : index
    %c0_43 = arith.constant 0 : index
    %55 = vector.load %arg6[%c1_42, %c0_43] : memref<8x128xf32, #tpu.memory_space<vmem>>, vector<1x128xf32>
    tpu.vector_store %arg6[%c1_42, %c0_43], %54 {strides = array<i32>} : memref<8x128xf32, #tpu.memory_space<vmem>>, vector<1x128xf32>,
    return
  }
  func.func @transform_0(%arg0: i32, %arg1: i32) -> (i32, i32) {
    %c0_i32 = arith.constant 0 : i32
    %c0_i32_0 = arith.constant 0 : i32
    return %arg0, %c0_i32 : i32, i32
  }
  func.func @transform_1(%arg0: i32, %arg1: i32) -> (i32, i32, i32) {
    %c0_i32 = arith.constant 0 : i32
    %c0_i32_0 = arith.constant 0 : i32
    %c0_i32_1 = arith.constant 0 : i32
    %c0_i32_2 = arith.constant 0 : i32
    return %c0_i32, %c0_i32_0, %c0_i32_1 : i32, i32, i32
  }
  func.func @transform_2(%arg0: i32, %arg1: i32) -> (i32, i32) {
    %c0_i32 = arith.constant 0 : i32
    %c0_i32_0 = arith.constant 0 : i32
    return %arg1, %c0_i32 : i32, i32
  }
  func.func @transform_3(%arg0: i32, %arg1: i32) -> (i32, i32) {
    %c1_i32 = arith.constant 1 : i32
    %0 = arith.muli %arg0, %c1_i32 : i32
    %1 = arith.addi %0, %arg1 : i32
    %c0_i32 = arith.constant 0 : i32
    %c0_i32_0 = arith.constant 0 : i32
    return %1, %c0_i32 : i32, i32
  }
  func.func @transform_4(%arg0: i32, %arg1: i32) -> (i32, i32) {
    %c1_i32 = arith.constant 1 : i32
    %0 = arith.muli %arg0, %c1_i32 : i32
    %1 = arith.addi %0, %arg1 : i32
    %c0_i32 = arith.constant 0 : i32
    %c0_i32_0 = arith.constant 0 : i32
    return %1, %c0_i32 : i32, i32
  }
}

module attributes {stable_mosaic.version = 11 : i64} {
  func.func @_bn_relu_kernel(%arg0: i32, %arg1: memref<72x128xbf16, #tpu.memory_space<vmem>>, %arg2: memref<2x128xf32, #tpu.memory_space<vmem>>, %arg3: memref<1x128xf32, #tpu.memory_space<vmem>>, %arg4: memref<1x128xf32, #tpu.memory_space<vmem>>, %arg5: memref<72x128xf32, #tpu.memory_space<vmem>>) attributes {dimension_semantics = [#tpu.dimension_semantics<parallel>], iteration_bounds = array<i64: 2>, scalar_prefetch = 0 : i64, scratch_operands = 0 : i64, tpu.core_type = #tpu.core_type<tc>, window_params = [{transform_indices = @transform_0, window_bounds = array<i64: 72, 128>}, {pipeline_mode = #tpu.pipeline_mode<synchronous>, transform_indices = @transform_1, window_bounds = array<i64: 2, 128>}, {pipeline_mode = #tpu.pipeline_mode<synchronous>, transform_indices = @transform_2, window_bounds = array<i64: 1, 128>}, {pipeline_mode = #tpu.pipeline_mode<synchronous>, transform_indices = @transform_3, window_bounds = array<i64: 1, 128>}, {transform_indices = @transform_4, window_bounds = array<i64: 72, 128>}]} {
    %c0 = arith.constant 0 : index
    %c0_0 = arith.constant 0 : index
    %0 = vector.load %arg2[%c0, %c0_0] : memref<2x128xf32, #tpu.memory_space<vmem>>, vector<1x128xf32>
    %cst = arith.constant 7.812500e-03 : f32
    %1 = vector.broadcast %cst : f32 to vector<1x128xf32>
    %2 = arith.mulf %0, %1 : vector<1x128xf32>
    %c1 = arith.constant 1 : index
    %c0_1 = arith.constant 0 : index
    %3 = vector.load %arg2[%c1, %c0_1] : memref<2x128xf32, #tpu.memory_space<vmem>>, vector<1x128xf32>
    %cst_2 = arith.constant 7.812500e-03 : f32
    %4 = vector.broadcast %cst_2 : f32 to vector<1x128xf32>
    %5 = arith.mulf %3, %4 : vector<1x128xf32>
    %6 = arith.mulf %2, %2 : vector<1x128xf32>
    %7 = arith.subf %5, %6 : vector<1x128xf32>
    %cst_3 = arith.constant 0.000000e+00 : f32
    %8 = vector.broadcast %cst_3 : f32 to vector<1x128xf32>
    %9 = arith.maximumf %7, %8 : vector<1x128xf32>
    %c0_4 = arith.constant 0 : index
    %c0_5 = arith.constant 0 : index
    %10 = vector.load %arg3[%c0_4, %c0_5] : memref<1x128xf32, #tpu.memory_space<vmem>>, vector<1x128xf32>
    %cst_6 = arith.constant 9.99999974E-6 : f32
    %11 = vector.broadcast %cst_6 : f32 to vector<1x128xf32>
    %12 = arith.addf %9, %11 : vector<1x128xf32>
    %13 = math.rsqrt %12 : vector<1x128xf32>
    %14 = arith.mulf %10, %13 : vector<1x128xf32>
    %c0_7 = arith.constant 0 : index
    %c0_8 = arith.constant 0 : index
    %15 = vector.load %arg4[%c0_7, %c0_8] : memref<1x128xf32, #tpu.memory_space<vmem>>, vector<1x128xf32>
    %16 = arith.mulf %2, %14 : vector<1x128xf32>
    %17 = arith.subf %15, %16 : vector<1x128xf32>
    %c0_9 = arith.constant 0 : index
    %c0_10 = arith.constant 0 : index
    %18 = vector.load %arg1[%c0_9, %c0_10] : memref<72x128xbf16, #tpu.memory_space<vmem>>, vector<72x128xbf16>
    %19 = arith.extf %18 : vector<72x128xbf16> to vector<72x128xf32>
    %20 = vector.broadcast %14 : vector<1x128xf32> to vector<72x128xf32>
    %21 = arith.mulf %19, %20 : vector<72x128xf32>
    %22 = vector.broadcast %17 : vector<1x128xf32> to vector<72x128xf32>
    %23 = arith.addf %21, %22 : vector<72x128xf32>
    %cst_11 = arith.constant 0.000000e+00 : f32
    %24 = vector.broadcast %cst_11 : f32 to vector<72x128xf32>
    %25 = arith.maximumf %23, %24 : vector<72x128xf32>
    %c0_12 = arith.constant 0 : index
    %c0_13 = arith.constant 0 : index
    %26 = vector.load %arg5[%c0_12, %c0_13] : memref<72x128xf32, #tpu.memory_space<vmem>>, vector<72x128xf32>
    tpu.vector_store %arg5[%c0_12, %c0_13], %25 {strides = array<i32>} : memref<72x128xf32, #tpu.memory_space<vmem>>, vector<72x128xf32>,
    return
  }
  func.func @transform_0(%arg0: i32) -> (i32, i32) {
    %c0_i32 = arith.constant 0 : i32
    %c0_i32_0 = arith.constant 0 : i32
    return %arg0, %c0_i32 : i32, i32
  }
  func.func @transform_1(%arg0: i32) -> (i32, i32) {
    %c0_i32 = arith.constant 0 : i32
    %c0_i32_0 = arith.constant 0 : i32
    %c0_i32_1 = arith.constant 0 : i32
    return %c0_i32, %c0_i32_0 : i32, i32
  }
  func.func @transform_2(%arg0: i32) -> (i32, i32) {
    %c0_i32 = arith.constant 0 : i32
    %c0_i32_0 = arith.constant 0 : i32
    %c0_i32_1 = arith.constant 0 : i32
    return %c0_i32, %c0_i32_0 : i32, i32
  }
  func.func @transform_3(%arg0: i32) -> (i32, i32) {
    %c0_i32 = arith.constant 0 : i32
    %c0_i32_0 = arith.constant 0 : i32
    %c0_i32_1 = arith.constant 0 : i32
    return %c0_i32, %c0_i32_0 : i32, i32
  }
  func.func @transform_4(%arg0: i32) -> (i32, i32) {
    %c0_i32 = arith.constant 0 : i32
    %c0_i32_0 = arith.constant 0 : i32
    return %arg0, %c0_i32 : i32, i32
  }
}

</mosaic_0001>

<bundles_post_ra>
// kernel: encoder_block_forward.3
= control target key start
LH: loop header
LB: loop body
LE: loop exit
PB: predicated region body
PF: predicated region fallthrough
CT: control target
= control target key end

     0   :  { %s408_s15 = smov 0   ;;  %s441_s0 = inlined_call_operand.vmem [shape: bf16[144,128], index: 0, kind: input, shape index: {}]   ;;  %s442_s1 = inlined_call_operand.vmem [shape: f32[2,128], index: 1, kind: input, shape index: {}]   ;;  %s443_s2 = inlined_call_operand.vmem [shape: f32[1,128], index: 2, kind: input, shape index: {}]   ;;  %s444_s3 = inlined_call_operand.vmem [shape: f32[1,128], index: 3, kind: input, shape index: {}]   ;;  %s445_s4 = inlined_call_operand.vmem [shape: f32[144,128], index: 4, kind: output, shape index: {}]  }
   0x1 LB: > { %s337_s16 = sadd.s32 4294967295, %s381_s15   ;;  %p341_p0 = scmp.ge.s32.totalorder %s381_s15, 1  ;;  %s381_s15 = sphi %s408_s15, %s14_s15  }
   0x2   : > { %p163_p1 = scmp.lt.s32.totalorder %s381_s15, 3 }
   0x4   : > { %p164_p2 = pnand %p341_p0, %p163_p1 }
   0x5   : > { %v201_v0 = vld [vmem:[%s442_s1] sm:$0x1] (!%p164_p2)  ;;  %v203_v1 = vld [vmem:[%s442_s1 + $0x1] sm:$0x1] (!%p164_p2)  ;;  %s189_s21 = smul.u32 (!%p164_p2), 9, %s337_s16  ;;  %v234_v8 = vlaneseq (!%p164_p2) }
   0x6   : > { %167 = sbr.rel (%p164_p2) target bundleno = 44 (0x2c), region = 36  ;;  %v202_v2 = vmul.f32 (!%p164_p2), 0.0078125, %v201_v0  ;;  %v204_v3 = vmul.f32 (!%p164_p2), 0.0078125, %v203_v1  ;;  %v208_v10 = vld [vmem:[%s443_s2] sm:$0x1] (!%p164_p2) }
   0x7   : > { %p190_p3 = scmp.lt.s32.totalorder (!%p164_p2), %s189_s21, 17  ;;  %v235_v9 = vshrl.u32 (!%p164_p2), %v234_v8, 7  ;;  %v212_v22 = vld [vmem:[%s444_s3] sm:$0x1] (!%p164_p2) }
   0x8   : > { %v205_v4 = vmul.f32 (!%p164_p2), %v202_v2, %v202_v2 }
   0x9   : > { %v236_v13 = vsub.s32 (!%p164_p2), 0, %v235_v9 }
   0xa   : > { %v206_v5 = vsub.f32 (!%p164_p2), %v204_v3, %v205_v4 }
   0xc   : > { %v207_v6 = vmax.f32 (!%p164_p2), %v206_v5, 0.0 }
   0xd   : > { %s447_s21 = smov (!%p190_p3, %s189_s21), 17 }
   0xe   : > { %v209_v7 = vadd.f32 1e-05, %v207_v6  ;;  %s342_s22 = sshll.u32 %s447_s21, 2  ;;  %s343_s30 = sshll.u32 %s447_s21, 3 }
   0xf   : > { %s193_s25 = scalar_lea.vmem %s441_s0, %s342_s22  ;;  %s199_s7 = scalar_lea.vmem %s445_s4, %s343_s30 }
  0x10   : > { %373 = vrsqrt.f32 %v209_v7  ;;  %v347_v11 = vld [vmem:[%s193_s25] sm:$0xff]   ;;  %v362_v12 = vld [vmem:[%s193_s25 + $0x8] sm:$0xff]   ;;  %v363_v14 = vld [vmem:[%s193_s25 + $0x10] sm:$0xff]  }
  0x11   : > { %v364_v15 = vld [vmem:[%s193_s25 + $0x18] sm:$0xff]   ;;  %v348_v18 = vunpack.c.l.bf16 %v347_v11  ;;  %v349_v19 = vunpack.c.h.bf16 %v347_v11  ;;  %v352_v20 = vunpack.c.l.bf16 %v362_v12  ;;  %v223_v21 = vld [vmem:[%s193_s25 + $0x20] sm:$0xf]  ;;  %v353_v23 = vunpack.c.h.bf16 %v362_v12 }
  0x12   : > { %v356_v24 = vunpack.c.l.bf16 %v363_v14  ;;  %v357_v25 = vunpack.c.h.bf16 %v363_v14  ;;  %v360_v26 = vunpack.c.l.bf16 %v364_v15  ;;  %v361_v29 = vunpack.c.h.bf16 %v364_v15 }
  0x13   : > { %v232_v30 = vunpack.c.l.bf16 %v223_v21 }
  0x1a   : > { %v374_v16 = vpop.eup %373 }
  0x1b   : > { %v211_v17 = vmul.f32 %v374_v16, %v208_v10 }
  0x1d   : > { %v213_v27 = vmul.f32 %v211_v17, %v202_v2  ;;  %v237_v28 = vrot.slane %v211_v17, %v236_v13 }
  0x1f   : > { %v214_v31 = vsub.f32 %v212_v22, %v213_v27  ;;  %v239_v32 = vmul.f32 %v348_v18, %v237_v28  ;;  %v240_v33 = vmul.f32 %v349_v19, %v237_v28  ;;  %v241_v34 = vmul.f32 %v352_v20, %v237_v28 }
  0x20   : > { %v242_v35 = vmul.f32 %v353_v23, %v237_v28  ;;  %v243_v36 = vmul.f32 %v356_v24, %v237_v28  ;;  %v244_v37 = vmul.f32 %v357_v25, %v237_v28  ;;  %v245_v38 = vmul.f32 %v360_v26, %v237_v28 }
  0x21   : > { %v252_v39 = vrot.slane %v214_v31, %v236_v13  ;;  %v246_v40 = vmul.f32 %v361_v29, %v237_v28  ;;  %v247_v41 = vmul.f32 %v237_v28, %v232_v30 }
  0x23   : > { %v254_v42 = vadd.f32 %v252_v39, %v239_v32  ;;  %v255_v43 = vadd.f32 %v252_v39, %v240_v33  ;;  %v256_v44 = vadd.f32 %v252_v39, %v241_v34  ;;  %v257_v45 = vadd.f32 %v252_v39, %v242_v35 }
  0x24   : > { %v258_v46 = vadd.f32 %v252_v39, %v243_v36  ;;  %v259_v47 = vadd.f32 %v252_v39, %v244_v37  ;;  %v260_v48 = vadd.f32 %v252_v39, %v245_v38  ;;  %v261_v49 = vadd.f32 %v252_v39, %v246_v40 }
  0x25   : > { %v263_v50 = vmax.f32 %v254_v42, 0.0  ;;  %v264_v51 = vmax.f32 %v255_v43, 0.0  ;;  %v265_v52 = vmax.f32 %v256_v44, 0.0  ;;  %v266_v53 = vmax.f32 %v257_v45, 0.0 }
  0x26   : > { %v267_v54 = vmax.f32 %v258_v46, 0.0  ;;  %v268_v55 = vmax.f32 %v259_v47, 0.0  ;;  %v269_v56 = vmax.f32 %v260_v48, 0.0  ;;  %v270_v57 = vmax.f32 %v261_v49, 0.0 }
  0x27   : > { %272 = vst [vmem:[%s199_s7] sm:$0xff] %v263_v50  ;;  %273 = vst [vmem:[%s199_s7 + $0x8] sm:$0xff] %v264_v51  ;;  %v262_v58 = vadd.f32 %v252_v39, %v247_v41 }
  0x28   : > { %274 = vst [vmem:[%s199_s7 + $0x10] sm:$0xff] %v265_v52  ;;  %275 = vst [vmem:[%s199_s7 + $0x18] sm:$0xff] %v266_v53 }
  0x29   : > { %276 = vst [vmem:[%s199_s7 + $0x20] sm:$0xff] %v267_v54  ;;  %277 = vst [vmem:[%s199_s7 + $0x28] sm:$0xff] %v268_v55  ;;  %v271_v59 = vmax.f32 %v262_v58, 0.0 }
  0x2a   : > { %278 = vst [vmem:[%s199_s7 + $0x30] sm:$0xff] %v269_v56  ;;  %279 = vst [vmem:[%s199_s7 + $0x38] sm:$0xff] %v270_v57 }
  0x2b   : > { %280 = vst [vmem:[%s199_s7 + $0x40] sm:$0xff] %v271_v59 }
  0x2c PF: > { %s14_s15 = sadd.s32 1, %s381_s15  }
  0x2d   : > { %p11_p4 = scmp.ge.s32.totalorder %s14_s15, 4  }
  0x2f   :  { %13 = sbr.rel (!%p11_p4) target bundleno = 1 (0x1), region = 66 }

// kernel: encoder_block_forward.2
= control target key start
LH: loop header
LB: loop body
LE: loop exit
PB: predicated region body
PF: predicated region fallthrough
CT: control target
= control target key end

     0   :  { %s1445_s15 = smov 0   ;;  %s1447_s16 = smov 0   ;;  %s1645_s0 = inlined_call_operand.vmem [shape: f32[176,16], index: 0, kind: input, shape index: {}]   ;;  %s1646_s1 = inlined_call_operand.vmem [shape: bf16[4,16,128], index: 1, kind: input, shape index: {}]   ;;  %s1647_s2 = inlined_call_operand.vmem [shape: f32[72,1], index: 2, kind: input, shape index: {}]   ;;  %s1648_s3 = inlined_call_operand.vmem [shape: bf16[144,128], index: 3, kind: output, shape index: {0}]   ;;  %s1649_s4 = inlined_call_operand.vmem [shape: f32[16,128], index: 4, kind: output, shape index: {1}]  }
   0x1   :  { %s1449_s17 = smov 0  }
   0x2 LB: > { %s27_s18 = sadd.s32 1, %s1411_s16  ;;  %p1095_p0 = scmp.ge.s32.totalorder %s1415_s17, 1  ;;  %s1415_s17 = sphi %s1449_s17, %s15_s17   ;;  %s1411_s16 = sphi %s1447_s16, %s1651_s16   ;;  %s1407_s15 = sphi %s1445_s15, %s1650_s15  }
   0x3   : > { %p29_p1 = scmp.ge.s32.totalorder %s27_s18, 2  ;;  %p193_p2 = scmp.lt.s32.totalorder %s1415_s17, 3 }
   0x5   : > { %s1653_s18 = smov (%p29_p1, %s27_s18), 0  ;;  %p194_p3 = pnand %p1095_p0, %p193_p2 }
   0x6   : > { %v1389_v0 = vld [vmem:[%s1646_s1] sm:$0xff] (!%p194_p3)   ;;  %v1417_v1 = vmov (!%p194_p3), 0.0   ;;  %v1390_v2 = vld [vmem:[%s1646_s1 + $0x10] sm:$0xff] (!%p194_p3)   ;;  %vm1418_vm0 = vmmov (!%p194_p3), 0   ;;  %s230_s23 = smul.u32 (!%p194_p3), 11, %s1407_s15  ;;  %v1419_v4 = vmov (!%p194_p3), 0  }
   0x7   : > { %197 = sbr.rel (%p194_p3) target bundleno = 330 (0x14a), region = 32  ;;  %1223 = vmatprep.subr.bf16.mxu1 (!%p194_p3), %v1417_v1  ;;  %1267 = vmatprep.subr.bf16.mxu0 (!%p194_p3), %v1417_v1  ;;  %v859_v3 = vld [vmem:[%s1647_s2] sm:$0xff] (!%p194_p3)  ;;  %v861_v5 = vld [vmem:[%s1647_s2 + $0x10] sm:$0xff] (!%p194_p3)  ;;  %v860_v6 = vld [vmem:[%s1647_s2 + $0x8] sm:$0xff] (!%p194_p3)  ;;  %vm281_vm1 = vcmask (!%p194_p3), 130048   ;;  %p251_p5 = scmp.lt.s32.totalorder (!%p194_p3), %s1407_s15, 1 }
   0x8   : > { %1224 = vmatpush3.bf16.msra.mxu1 (!%p194_p3), %v1389_v0  ;;  %1225 = vmatprep.mubr.msk.bf16.mxu1 (!%p194_p3), %vm1418_vm0, %v1417_v1  ;;  %p231_p4 = scmp.lt.s32.totalorder (!%p194_p3), %s230_s23, 21  ;;  %v862_v7 = vld [vmem:[%s1647_s2 + $0x18] sm:$0xff] (!%p194_p3)  ;;  %v1391_v8 = vld [vmem:[%s1646_s1 + $0x8] sm:$0xff] (!%p194_p3)   ;;  %v863_v16 = vld [vmem:[%s1647_s2 + $0x20] sm:$0xff] (!%p194_p3)  ;;  %s243_s7 = smul.u32 (!%p194_p3), 9, %s1407_s15 }
   0x9   : > { %1268 = vmatpush3.bf16.msra.mxu0 (!%p194_p3), %v1390_v2  ;;  %1245 = vmatprep.subr.bf16.mxu1 (!%p194_p3), %v1417_v1  ;;  %v1392_v14 = vld [vmem:[%s1646_s1 + $0x18] sm:$0xff] (!%p194_p3)   ;;  %v864_v19 = vld [vmem:[%s1647_s2 + $0x28] sm:$0xff] (!%p194_p3)  ;;  %v865_v24 = vld [vmem:[%s1647_s2 + $0x30] sm:$0xff] (!%p194_p3) }
   0xa   : > { %1269 = vmatprep.mubr.msk.bf16.mxu0 (!%p194_p3), %vm1418_vm0, %v1417_v1  ;;  %1289 = vmatprep.subr.bf16.mxu0 (!%p194_p3), %v1417_v1  ;;  %v866_v25 = vld [vmem:[%s1647_s2 + $0x38] sm:$0xff] (!%p194_p3)  ;;  %v867_v28 = vld [vmem:[%s1647_s2 + $0x40] sm:$0xff] (!%p194_p3)  ;;  %p244_p6 = scmp.lt.s32.totalorder (!%p194_p3), %s243_s7, 17 }
   0xb   : > { %1387 = vset.pattern.permute.xlu0 (!%p194_p3), %v1419_v4  ;;  %1388 = vset.pattern.permute.xlu1 (!%p194_p3), %v1419_v4 }
   0xc   : > { %870 = vperm.xlu0 (!%p194_p3), %1387, %v859_v3   ;;  %880 = vperm.xlu1 (!%p194_p3), %1388, %v861_v5  }
   0xe   : > { %s1655_s23 = smov (!%p231_p4, %s230_s23), 21  ;;  %s1657_s7 = smov (!%p244_p6, %s243_s7), 17 }
   0xf   : > { %s1096_s6 = sshll.u32 %s1655_s23, 3  ;;  %s1097_s8 = sshll.u32 %s1657_s7, 2 }
  0x10   : > { %s1495_s9 = scalar_lea.vmem %s1645_s0, %s1096_s6  ;;  %875 = vperm.xlu0 %1387, %v860_v6   ;;  %885 = vperm.xlu1 %1388, %v862_v7   ;;  %s1627_s11 = scalar_lea.vmem %s1648_s3, %s1097_s8 }
  0x11   : > { %v259_v9 = vld [vmem:[%s1495_s9] sm:$0xff]  ;;  %v260_v10 = vld [vmem:[%s1495_s9 + $0x8] sm:$0xff]  ;;  %v1506_v13 = vld [vmem:[%s1495_s9 + $0x11] sm:$0xff]  ;;  %s252_s28 = scalar_select %p251_p5, %s1407_s15, 1 }
  0x12   : > { %v1503_v11 = vld [vmem:[%s1495_s9 + $0x9] sm:$0xff]  ;;  %v268_v12 = vpack.c.bf16 %v260_v10, %v259_v9  ;;  %v262_v18 = vld [vmem:[%s1495_s9 + $0x18] sm:$0xff]  ;;  %v1527_v21 = vld [vmem:[%s1495_s9 + $0x21] sm:$0xff] }
  0x13   : > { %v528_v15 = vpack.c.bf16 %v1506_v13, %v1503_v11  ;;  %v261_v17 = vld [vmem:[%s1495_s9 + $0x10] sm:$0xff]  ;;  %v1124_v20 = vld [vmem:[%s1495_s9 + $0x19] sm:$0xff]  ;;  %v264_v27 = vld [vmem:[%s1495_s9 + $0x28] sm:$0xff]  ;;  %s1098_s29 = sshll.u32 %s252_s28, 3 }
  0x14   : > { %1226 = vmatmul.mubr.msk.bf16.vlgmr.msra.gmra.mrb[0].mxu1 %vm281_vm1, %v268_v12  ;;  %v269_v22 = vpack.c.bf16 %v262_v18, %v261_v17  ;;  %890 = vperm.xlu0 %1387, %v863_v16   ;;  %v529_v23 = vpack.c.bf16 %v1527_v21, %v1124_v20  ;;  %v263_v26 = vld [vmem:[%s1495_s9 + $0x20] sm:$0xff]  ;;  %v1126_v29 = vld [vmem:[%s1495_s9 + $0x29] sm:$0xff]  ;;  %v1127_v30 = vld [vmem:[%s1495_s9 + $0x31] sm:$0xff]  ;;  %v390_v50 = vpack.c.bf16 %v1124_v20, %v1506_v13  ;;  %s1619_s6 = scalar_lea.vmem %s1649_s4, %s1098_s29 }
  0x15   : > { %1246 = vmatpush3.bf16.msra.mxu1 %v1391_v8  ;;  %1270 = vmatmul.mubr.msk.bf16.vlgmr.msra.gmra.mrb[0].mxu0 %vm281_vm1, %v528_v15  ;;  %v270_v31 = vpack.c.bf16 %v264_v27, %v263_v26  ;;  %v530_v32 = vpack.c.bf16 %v1127_v30, %v1126_v29  ;;  %v265_v33 = vld [vmem:[%s1495_s9 + $0x30] sm:$0xff]  ;;  %v266_v34 = vld [vmem:[%s1495_s9 + $0x38] sm:$0xff]  ;;  %v1129_v36 = vld [vmem:[%s1495_s9 + $0x41] sm:$0xff]  ;;  %v391_v54 = vpack.c.bf16 %v1126_v29, %v1527_v21 }
  0x16   : > { %1290 = vmatpush3.bf16.msra.mxu0 %v1392_v14  ;;  %1229 = vmatprep.mubr.msk.bf16.mxu1 %vm1418_vm0, %v1417_v1  ;;  %v1128_v35 = vld [vmem:[%s1495_s9 + $0x39] sm:$0xff]  ;;  %v271_v37 = vpack.c.bf16 %v266_v34, %v265_v33  ;;  %v1130_v40 = vld [vmem:[%s1495_s9 + $0x49] sm:$0xff]  ;;  %v1105_v43 = vld [vmem:[%s1495_s9 + $0x1] sm:$0xff]  ;;  %v393_v61 = vpack.c.bf16 %v1129_v36, %v1129_v36  ;;  %922 = vst [vmem:[%s1619_s6] sm:$0xff] %v1417_v1 }
  0x17   : > { %1273 = vmatprep.mubr.msk.bf16.mxu0 %vm1418_vm0, %v1417_v1  ;;  %895 = vperm.xlu1 %1388, %v864_v19   ;;  %v531_v38 = vpack.c.bf16 %v1129_v36, %v1128_v35  ;;  %v267_v39 = vld [vmem:[%s1495_s9 + $0x40] sm:$0xff]  ;;  %v532_v42 = vpack.c.bf16 %v1130_v40, %v1130_v40  ;;  %v1139_v44 = vld [vmem:[%s1495_s9 + $0xa] sm:$0xff]  ;;  %v1140_v45 = vld [vmem:[%s1495_s9 + $0x12] sm:$0xff]  ;;  %v389_v46 = vpack.c.bf16 %v1503_v11, %v1105_v43 }
  0x18   : > { %900 = vperm.xlu0 %1387, %v865_v24   ;;  %v272_v41 = vpack.c.bf16 %v267_v39, %v267_v39  ;;  %v667_v47 = vpack.c.bf16 %v1140_v45, %v1139_v44  ;;  %v1141_v48 = vld [vmem:[%s1495_s9 + $0x1a] sm:$0xff]  ;;  %v1142_v49 = vld [vmem:[%s1495_s9 + $0x22] sm:$0xff]  ;;  %v1143_v52 = vld [vmem:[%s1495_s9 + $0x2a] sm:$0xff]  ;;  %v392_v58 = vpack.c.bf16 %v1128_v35, %v1127_v30 }
  0x19   : > { %v668_v51 = vpack.c.bf16 %v1142_v49, %v1141_v48  ;;  %v1144_v53 = vld [vmem:[%s1495_s9 + $0x32] sm:$0xff]  ;;  %v1145_v56 = vld [vmem:[%s1495_s9 + $0x3a] sm:$0xff]  ;;  %v1146_v57 = vld [vmem:[%s1495_s9 + $0x42] sm:$0xff] }
  0x1a   : > { %v669_v55 = vpack.c.bf16 %v1144_v53, %v1143_v52  ;;  %v670_v59 = vpack.c.bf16 %v1146_v57, %v1145_v56  ;;  %v1147_v60 = vld [vmem:[%s1495_s9 + $0x4a] sm:$0xff] }
  0x1b   : > { %905 = vperm.xlu1 %1388, %v866_v25   ;;  %v671_v62 = vpack.c.bf16 %v1147_v60, %v1147_v60 }
  0x1c   : > { %1230 = vmatmul.mubr.msk.bf16.gmra.mrb[4].mxu1 %vm281_vm1, %v269_v22  ;;  %910 = vperm.xlu0 %1387, %v867_v28  }
  0x1d   : > { %1274 = vmatmul.mubr.msk.bf16.gmra.mrb[4].mxu0 %vm281_vm1, %v529_v23  ;;  %1233 = vmatprep.mubr.msk.bf16.mxu1 %vm1418_vm0, %v1417_v1 }
  0x1e   : > { %1277 = vmatprep.mubr.msk.bf16.mxu0 %vm1418_vm0, %v1417_v1 }
  0x24   : > { %1234 = vmatmul.mubr.msk.bf16.gmra.mrb[8].mxu1 %vm281_vm1, %v270_v31 }
  0x25   : > { %1278 = vmatmul.mubr.msk.bf16.gmra.mrb[8].mxu0 %vm281_vm1, %v530_v32  ;;  %1237 = vmatprep.mubr.msk.bf16.mxu1 %vm1418_vm0, %v1417_v1 }
  0x26   : > { %1281 = vmatprep.mubr.msk.bf16.mxu0 %vm1418_vm0, %v1417_v1 }
  0x2c   : > { %1238 = vmatmul.mubr.msk.bf16.gmra.mrb[12].mxu1 %vm281_vm1, %v271_v37 }
  0x2d   : > { %1282 = vmatmul.mubr.msk.bf16.gmra.mrb[12].mxu0 %vm281_vm1, %v531_v38  ;;  %1241 = vmatprep.mubr.msk.bf16.mxu1 %vm1418_vm0, %v1417_v1 }
  0x2e   : > { %1285 = vmatprep.mubr.msk.bf16.mxu0 %vm1418_vm0, %v1417_v1 }
  0x34   : > { %1242 = vmatmul.mubr.msk.bf16.gmra.mrb[16].mxu1 %vm281_vm1, %v272_v41 }
  0x35   : > { %1286 = vmatmul.mubr.msk.bf16.gmra.mrb[16].mxu0 %vm281_vm1, %v532_v42  ;;  %1247 = vmatprep.mubr.msk.bf16.mxu1 %vm1418_vm0, %v1417_v1 }
  0x36   : > { %1291 = vmatprep.mubr.msk.bf16.mxu0 %vm1418_vm0, %v1417_v1 }
  0x3c   : > { %1248 = vmatmul.mubr.msk.bf16.vlgmr.msra.gmra.mrb[0].mxu1 %vm281_vm1, %v389_v46 }
  0x3d   : > { %1292 = vmatmul.mubr.msk.bf16.vlgmr.msra.gmra.mrb[0].mxu0 %vm281_vm1, %v667_v47  ;;  %1251 = vmatprep.mubr.msk.bf16.mxu1 %vm1418_vm0, %v1417_v1 }
  0x3e   : > { %1295 = vmatprep.mubr.msk.bf16.mxu0 %vm1418_vm0, %v1417_v1 }
  0x44   : > { %1252 = vmatmul.mubr.msk.bf16.gmra.mrb[4].mxu1 %vm281_vm1, %v390_v50 }
  0x45   : > { %1296 = vmatmul.mubr.msk.bf16.gmra.mrb[4].mxu0 %vm281_vm1, %v668_v51  ;;  %1255 = vmatprep.mubr.msk.bf16.mxu1 %vm1418_vm0, %v1417_v1 }
  0x46   : > { %1299 = vmatprep.mubr.msk.bf16.mxu0 %vm1418_vm0, %v1417_v1 }
  0x4c   : > { %1256 = vmatmul.mubr.msk.bf16.gmra.mrb[8].mxu1 %vm281_vm1, %v391_v54 }
  0x4d   : > { %1300 = vmatmul.mubr.msk.bf16.gmra.mrb[8].mxu0 %vm281_vm1, %v669_v55  ;;  %1259 = vmatprep.mubr.msk.bf16.mxu1 %vm1418_vm0, %v1417_v1 }
  0x4e   : > { %1303 = vmatprep.mubr.msk.bf16.mxu0 %vm1418_vm0, %v1417_v1 }
  0x54   : > { %1260 = vmatmul.mubr.msk.bf16.gmra.mrb[12].mxu1 %vm281_vm1, %v392_v58 }
  0x55   : > { %1304 = vmatmul.mubr.msk.bf16.gmra.mrb[12].mxu0 %vm281_vm1, %v670_v59  ;;  %1263 = vmatprep.mubr.msk.bf16.mxu1 %vm1418_vm0, %v1417_v1 }
  0x56   : > { %1307 = vmatprep.mubr.msk.bf16.mxu0 %vm1418_vm0, %v1417_v1 }
  0x5c   : > { %1264 = vmatmul.mubr.msk.bf16.gmra.mrb[16].mxu1 %vm281_vm1, %v393_v61 }
  0x5d   : > { %1308 = vmatmul.mubr.msk.bf16.gmra.mrb[16].mxu0 %vm281_vm1, %v671_v62 }
  0x8b   : > { %v871_v0 = vpop.permute.xlu0 %870  ;;  %v881_v15 = vpop.permute.xlu1 %880 }
  0x8f   : > { %v876_v11 = vpop.permute.xlu0 %875  ;;  %v886_v28 = vpop.permute.xlu1 %885 }
  0x93   : > { %v891_v53 = vpop.permute.xlu0 %890 }
  0x96   : > { %v896_v56 = vpop.permute.xlu1 %895 }
 0x10f   : > { %v461_v63 = vpop.f32.mrb[0].mxu1 }
 0x110   : > { %v739_v2 = vpop.f32.mrb[0].mxu0  ;;  %v1249_v3 = vpop.f32.mrb[1].mxu1 }
 0x111   : > { %v1311_v4 = vadd.f32 %v739_v2, %v461_v63  ;;  %v1293_v5 = vpop.f32.mrb[1].mxu0  ;;  %v464_v6 = vpop.f32.mrb[2].mxu1 }
 0x112   : > { %v742_v7 = vpop.f32.mrb[2].mxu0  ;;  %v1250_v8 = vpop.f32.mrb[3].mxu1 }
 0x113   : > { %v1312_v9 = vadd.f32 %v742_v7, %v464_v6  ;;  %v1294_v10 = vpop.f32.mrb[3].mxu0 }
 0x115   : > { %v804_v1 = vpack.c.bf16 %v1312_v9, %v1311_v4 }
 0x117   : > { %1180 = vst [vmem:[%s1627_s11] sm:$0xff] %v804_v1   ;;  %v850_v12 = vunpack.c.l.bf16 %v804_v1  ;;  %v851_v13 = vunpack.c.h.bf16 %v804_v1  ;;  %v469_v14 = vpop.f32.mrb[4].mxu1 }
 0x118   : > { %v747_v16 = vpop.f32.mrb[4].mxu0  ;;  %v1253_v17 = vpop.f32.mrb[5].mxu1 }
 0x119   : > { %v1313_v18 = vadd.f32 %v747_v16, %v469_v14  ;;  %v1297_v19 = vpop.f32.mrb[5].mxu0  ;;  %v472_v20 = vpop.f32.mrb[6].mxu1  ;;  %v913_v23 = vmul.f32 %v871_v0, %v850_v12  ;;  %v914_v24 = vmul.f32 %v876_v11, %v851_v13 }
 0x11a   : > { %v750_v21 = vpop.f32.mrb[6].mxu0  ;;  %v1254_v22 = vpop.f32.mrb[7].mxu1 }
 0x11b   : > { %v1314_v25 = vadd.f32 %v750_v21, %v472_v20  ;;  %v1298_v26 = vpop.f32.mrb[7].mxu0  ;;  %v938_v29 = vmul.f32 %v913_v23, %v850_v12  ;;  %v939_v30 = vmul.f32 %v914_v24, %v851_v13  ;;  %v923_v36 = vadd.f32 %v914_v24, %v913_v23  ;;  %v901_v12 = vpop.permute.xlu0 %900 }
 0x11c   : > { %v906_v14 = vpop.permute.xlu1 %905 }
 0x11d   : > { %v805_v27 = vpack.c.bf16 %v1314_v25, %v1313_v18  ;;  %v947_v44 = vadd.f32 %v939_v30, %v938_v29 }
 0x11f   : > { %1196 = vst [vmem:[%s1627_s11 + $0x8] sm:$0xff] %v805_v27   ;;  %v852_v31 = vunpack.c.l.bf16 %v805_v27  ;;  %v853_v32 = vunpack.c.h.bf16 %v805_v27  ;;  %v477_v33 = vpop.f32.mrb[8].mxu1 }
 0x120   : > { %v755_v34 = vpop.f32.mrb[8].mxu0  ;;  %v1257_v35 = vpop.f32.mrb[9].mxu1 }
 0x121   : > { %v915_v37 = vmul.f32 %v881_v15, %v852_v31  ;;  %v916_v38 = vmul.f32 %v886_v28, %v853_v32  ;;  %v1315_v39 = vadd.f32 %v755_v34, %v477_v33  ;;  %v1301_v40 = vpop.f32.mrb[9].mxu0  ;;  %v480_v41 = vpop.f32.mrb[10].mxu1 }
 0x122   : > { %v758_v42 = vpop.f32.mrb[10].mxu0  ;;  %v1258_v43 = vpop.f32.mrb[11].mxu1 }
 0x123   : > { %v924_v45 = vadd.f32 %v923_v36, %v915_v37  ;;  %v940_v46 = vmul.f32 %v915_v37, %v852_v31  ;;  %v1316_v47 = vadd.f32 %v758_v42, %v480_v41  ;;  %v1302_v48 = vpop.f32.mrb[11].mxu0  ;;  %v941_v51 = vmul.f32 %v916_v38, %v853_v32  ;;  %v911_v35 = vpop.permute.xlu0 %910 }
 0x125   : > { %v948_v49 = vadd.f32 %v947_v44, %v940_v46  ;;  %v925_v50 = vadd.f32 %v924_v45, %v916_v38  ;;  %v806_v52 = vpack.c.bf16 %v1316_v47, %v1315_v39 }
 0x127   : > { %v949_v54 = vadd.f32 %v948_v49, %v941_v51  ;;  %1197 = vst [vmem:[%s1627_s11 + $0x10] sm:$0xff] %v806_v52   ;;  %v854_v55 = vunpack.c.l.bf16 %v806_v52  ;;  %v855_v57 = vunpack.c.h.bf16 %v806_v52  ;;  %v485_v58 = vpop.f32.mrb[12].mxu1 }
 0x128   : > { %v763_v59 = vpop.f32.mrb[12].mxu0  ;;  %v1261_v60 = vpop.f32.mrb[13].mxu1 }
 0x129   : > { %v917_v61 = vmul.f32 %v891_v53, %v854_v55  ;;  %v918_v62 = vmul.f32 %v896_v56, %v855_v57  ;;  %v1317_v63 = vadd.f32 %v763_v59, %v485_v58  ;;  %v1305_v0 = vpop.f32.mrb[13].mxu0  ;;  %v488_v2 = vpop.f32.mrb[14].mxu1 }
 0x12a   : > { %v766_v3 = vpop.f32.mrb[14].mxu0  ;;  %v1262_v4 = vpop.f32.mrb[15].mxu1 }
 0x12b   : > { %v926_v5 = vadd.f32 %v925_v50, %v917_v61  ;;  %v942_v6 = vmul.f32 %v917_v61, %v854_v55  ;;  %v1318_v7 = vadd.f32 %v766_v3, %v488_v2  ;;  %v1306_v8 = vpop.f32.mrb[15].mxu0  ;;  %v943_v10 = vmul.f32 %v918_v62, %v855_v57 }
 0x12d   : > { %v927_v9 = vadd.f32 %v926_v5, %v918_v62  ;;  %v950_v1 = vadd.f32 %v949_v54, %v942_v6  ;;  %v807_v11 = vpack.c.bf16 %v1318_v7, %v1317_v63 }
 0x12f   : > { %v951_v13 = vadd.f32 %v950_v1, %v943_v10  ;;  %1198 = vst [vmem:[%s1627_s11 + $0x18] sm:$0xff] %v807_v11   ;;  %v856_v15 = vunpack.c.l.bf16 %v807_v11  ;;  %v857_v16 = vunpack.c.h.bf16 %v807_v11  ;;  %v493_v17 = vpop.f32.mrb[16].mxu1 }
 0x130   : > { %v771_v18 = vpop.f32.mrb[16].mxu0  ;;  %v1265_v19 = vpop.f32.mrb[17].mxu1 }
 0x131   : > { %v919_v20 = vmul.f32 %v901_v12, %v856_v15  ;;  %v920_v21 = vmul.f32 %v906_v14, %v857_v16  ;;  %v1319_v22 = vadd.f32 %v771_v18, %v493_v17  ;;  %v1309_v23 = vpop.f32.mrb[17].mxu0  ;;  %v496_v24 = vpop.f32.mrb[18].mxu1 }
 0x132   : > { %v774_v25 = vpop.f32.mrb[18].mxu0  ;;  %v1266_v26 = vpop.f32.mrb[19].mxu1 }
 0x133   : > { %v944_v27 = vmul.f32 %v919_v20, %v856_v15  ;;  %v808_v28 = vpack.c.bf16 %v1319_v22, %v1319_v22  ;;  %v928_v29 = vadd.f32 %v927_v9, %v919_v20  ;;  %v1310_v30 = vpop.f32.mrb[19].mxu0  ;;  %v945_v31 = vmul.f32 %v920_v21, %v857_v16 }
 0x135   : > { %849 = vst [vmem:[%s1627_s11 + $0x20] sm:$0xf] %v808_v28  ;;  %v858_v32 = vunpack.c.l.bf16 %v808_v28  ;;  %v929_v33 = vadd.f32 %v928_v29, %v920_v21  ;;  %v952_v34 = vadd.f32 %v951_v13, %v944_v27 }
 0x137   : > { %v921_v36 = vmul.f32 %v911_v35, %v858_v32  ;;  %v953_v37 = vadd.f32 %v952_v34, %v945_v31 }
 0x139   : > { %v930_v38 = vadd.f32 %v929_v33, %v921_v36  ;;  %v946_v39 = vmul.f32 %v921_v36, %v858_v32 }
 0x13b   : > { %v931_v40 = vrot.slane %v930_v38, 4  ;;  %v954_v41 = vadd.f32 %v953_v37, %v946_v39 }
 0x13d   : > { %v932_v42 = vadd.f32 %v931_v40, %v930_v38  ;;  %v955_v43 = vrot.slane %v954_v41, 4 }
 0x13f   : > { %v933_v44 = vrot.slane %v932_v42, 2  ;;  %v956_v45 = vadd.f32 %v955_v43, %v954_v41 }
 0x141   : > { %v934_v46 = vadd.f32 %v933_v44, %v932_v42  ;;  %v957_v47 = vrot.slane %v956_v45, 2 }
 0x143   : > { %v935_v48 = vrot.slane %v934_v46, 1  ;;  %v958_v49 = vadd.f32 %v957_v47, %v956_v45 }
 0x145   : > { %v936_v50 = vadd.f32 %v935_v48, %v934_v46  ;;  %v959_v51 = vrot.slane %v958_v49, 1 }
 0x147   : > { %937 = vst [vmem:[%s1619_s6] sm:$0x1] %v936_v50  ;;  %v960_v52 = vadd.f32 %v959_v51, %v958_v49 }
 0x149   : > { %961 = vst [vmem:[%s1619_s6 + $0x1] sm:$0x1] %v960_v52 }
 0x14a PF: > { %s15_s17 = sadd.s32 1, %s1415_s17   ;;  %s1650_s15 = smov %s1411_s16 }
 0x14b   : > { %p12_p7 = scmp.ge.s32.totalorder %s15_s17, 4   ;;  %s1651_s16 = smov %s1653_s18 }
 0x14d   :  { %14 = sbr.rel (!%p12_p7) target bundleno = 2 (0x2), region = 84 }

</bundles_post_ra>
